<compile_context>
chip_gen: v7x
topology: tpu7x:2x2x1
jax: 0.10.0
libtpu: 0.0.40
codegen_flags: <defaults>
</compile_context>

<pallas_src>
import functools
import math

import jax
import jax.numpy as jnp
from jax import lax
from jax.experimental import pallas as pl
from jax.experimental.pallas import tpu as pltpu


def _round_up(x, m):
    return (x + m - 1) // m * m


def _embed_gather_kernel(ids_ref, table_ref, out_ref, *, scale, tile_tokens, unroll):
    """One tile of `tile_tokens` tokens.

    ids_ref   : SMEM (N_pad,) int32       scalar-prefetched token ids
    table_ref : VMEM (V, 1, D)            embedding table, resident across grid
    out_ref   : VMEM (tile_tokens, 1, D)  scaled embeddings for this tile
    """
    base = pl.program_id(0) * tile_tokens

    def body(g, carry):
        row0 = g * unroll
        for k in range(unroll):              # static unroll amortizes loop overhead
            r = row0 + k
            tok = ids_ref[base + r]          # scalar read from SMEM
            out_ref[r] = table_ref[tok] * scale   # (1, D) row gather + sqrt(D) scale
        return carry

    lax.fori_loop(0, tile_tokens // unroll, body, 0)


def input_embedding(x, table, *, tile_tokens=512):
    """x: (B, S) integer token ids; table: (V, D) embedding weights."""
    B, S = x.shape
    V, D = table.shape
    N = B * S
    scale = math.sqrt(D)

    # Tile the token dimension (multiple of 8 sublanes, capped at tile_tokens).
    tn = min(_round_up(tile_tokens, 8), _round_up(N, 8))
    n_pad = _round_up(N, tn)
    unroll = 8                                # tn is always a multiple of 8

    ids = x.reshape(N).astype(jnp.int32)
    # PyTorch nn.Embedding raises on out-of-range ids; a VMEM dynamic index has
    # no bounds check, so clamp to avoid reading garbage on invalid input.
    ids = jnp.clip(ids, 0, V - 1)
    ids = jnp.pad(ids, (0, n_pad - N))        # pad with token 0 (rows discarded)

    # Leading-dim layout so all data-dependent indexing lands on an untiled dim.
    table3 = table.reshape(V, 1, D)

    kernel = functools.partial(
        _embed_gather_kernel, scale=scale, tile_tokens=tn, unroll=unroll)

    itemsize = jnp.dtype(table.dtype).itemsize
    cost = pl.CostEstimate(
        flops=int(n_pad * D),                 # just the *sqrt(D) multiply
        transcendentals=0,
        bytes_accessed=int(n_pad * 4 + V * D * itemsize + n_pad * D * itemsize),
    )

    out = pl.pallas_call(
        kernel,
        out_shape=jax.ShapeDtypeStruct((n_pad, 1, D), table.dtype),
        grid_spec=pltpu.PrefetchScalarGridSpec(
            num_scalar_prefetch=1,            # token ids -> SMEM
            grid=(n_pad // tn,),
            in_specs=[
                # Full table, constant block index -> DMA'd into VMEM once.
                pl.BlockSpec((V, 1, D), lambda i, ids_smem: (0, 0, 0)),
            ],
            out_specs=pl.BlockSpec((tn, 1, D), lambda i, ids_smem: (i, 0, 0)),
        ),
        compiler_params=pltpu.CompilerParams(
            dimension_semantics=("parallel",),
            vmem_limit_bytes=32 * 1024 * 1024,
        ),
        cost_estimate=cost,
    )(ids, table3)

    return out[:N, 0, :].reshape(B, S, D)


if __name__ == "__main__":
    vocab_size = 32
    d_model = 128
    batch, seq = 2, 8

    key = jax.random.PRNGKey(0)
    k_ids, k_w = jax.random.split(key)

    # deterministic "parameters": nn.Embedding default init is N(0, 1)
    table = jax.random.normal(k_w, (vocab_size, d_model), dtype=jnp.float32)
    # deterministic input token ids
    x = jax.random.randint(k_ids, (batch, seq), 0, vocab_size, dtype=jnp.int32)

    out = input_embedding(x, table)
    out = jax.block_until_ready(out)

    # pure-JAX reference
    ref = jnp.take(table, x, axis=0) * math.sqrt(d_model)
    assert out.shape == (batch, seq, d_model)
    assert out.dtype == jnp.float32
    assert jnp.allclose(out, ref, atol=1e-5, rtol=1e-5)

    print("KERNEL_OK")
</pallas_src>

<mosaic_0001>
module attributes {stable_mosaic.version = 11 : i64} {
  func.func @_embed_gather_kernel(%arg0: i32, %arg1: memref<16xi32, #tpu.memory_space<smem>>, %arg2: memref<32x1x128xf32, #tpu.memory_space<vmem>>, %arg3: memref<16x1x128xf32, #tpu.memory_space<vmem>>) attributes {dimension_semantics = [#tpu.dimension_semantics<parallel>], iteration_bounds = array<i64: 1>, scalar_prefetch = 1 : i64, scratch_operands = 0 : i64, tpu.core_type = #tpu.core_type<tc>, window_params = [{pipeline_mode = #tpu.pipeline_mode<synchronous>, transform_indices = @transform_0, window_bounds = array<i64: 32, 1, 128>}, {transform_indices = @transform_1, window_bounds = array<i64: 16, 1, 128>}]} {
    %c16_i32 = arith.constant 16 : i32
    %0 = arith.muli %arg0, %c16_i32 : i32
    %c0_i32 = arith.constant 0 : i32
    %c2_i32 = arith.constant 2 : i32
    %1 = arith.addi %c0_i32, %c2_i32 : i32
    %c1_i32 = arith.constant 1 : i32
    scf.for %arg4 = %c0_i32 to %1 step %c1_i32  : i32 {
      %c8_i32 = arith.constant 8 : i32
      %2 = arith.muli %arg4, %c8_i32 : i32
      %c0_i32_1 = arith.constant 0 : i32
      %3 = arith.addi %2, %c0_i32_1 : i32
      %4 = arith.addi %0, %3 : i32
      %5 = arith.index_cast %4 : i32 to index
      %6 = memref.load %arg1[%5] : memref<16xi32, #tpu.memory_space<smem>>
      %7 = arith.index_cast %6 : i32 to index
      %c0 = arith.constant 0 : index
      %c0_2 = arith.constant 0 : index
      %8 = vector.load %arg2[%7, %c0, %c0_2] : memref<32x1x128xf32, #tpu.memory_space<vmem>>, vector<1x1x128xf32>
      %9 = vector.shape_cast %8 : vector<1x1x128xf32> to vector<1x128xf32>
      %cst = arith.constant 11.3137083 : f32
      %10 = vector.broadcast %cst : f32 to vector<1x128xf32>
      %11 = arith.mulf %9, %10 : vector<1x128xf32>
      %12 = arith.index_cast %3 : i32 to index
      %c0_3 = arith.constant 0 : index
      %c0_4 = arith.constant 0 : index
      %13 = vector.load %arg3[%12, %c0_3, %c0_4] : memref<16x1x128xf32, #tpu.memory_space<vmem>>, vector<1x1x128xf32>
      %14 = vector.shape_cast %13 : vector<1x1x128xf32> to vector<1x128xf32>
      %15 = vector.shape_cast %11 : vector<1x128xf32> to vector<1x1x128xf32>
      tpu.vector_store %arg3[%12, %c0_3, %c0_4], %15 {strides = array<i32>} : memref<16x1x128xf32, #tpu.memory_space<vmem>>, vector<1x1x128xf32>,
      %c1_i32_5 = arith.constant 1 : i32
      %16 = arith.addi %2, %c1_i32_5 : i32
      %17 = arith.addi %0, %16 : i32
      %18 = arith.index_cast %17 : i32 to index
      %19 = memref.load %arg1[%18] : memref<16xi32, #tpu.memory_space<smem>>
      %20 = arith.index_cast %19 : i32 to index
      %c0_6 = arith.constant 0 : index
      %c0_7 = arith.constant 0 : index
      %21 = vector.load %arg2[%20, %c0_6, %c0_7] : memref<32x1x128xf32, #tpu.memory_space<vmem>>, vector<1x1x128xf32>
      %22 = vector.shape_cast %21 : vector<1x1x128xf32> to vector<1x128xf32>
      %cst_8 = arith.constant 11.3137083 : f32
      %23 = vector.broadcast %cst_8 : f32 to vector<1x128xf32>
      %24 = arith.mulf %22, %23 : vector<1x128xf32>
      %25 = arith.index_cast %16 : i32 to index
      %c0_9 = arith.constant 0 : index
      %c0_10 = arith.constant 0 : index
      %26 = vector.load %arg3[%25, %c0_9, %c0_10] : memref<16x1x128xf32, #tpu.memory_space<vmem>>, vector<1x1x128xf32>
      %27 = vector.shape_cast %26 : vector<1x1x128xf32> to vector<1x128xf32>
      %28 = vector.shape_cast %24 : vector<1x128xf32> to vector<1x1x128xf32>
      tpu.vector_store %arg3[%25, %c0_9, %c0_10], %28 {strides = array<i32>} : memref<16x1x128xf32, #tpu.memory_space<vmem>>, vector<1x1x128xf32>,
      %c2_i32_11 = arith.constant 2 : i32
      %29 = arith.addi %2, %c2_i32_11 : i32
      %30 = arith.addi %0, %29 : i32
      %31 = arith.index_cast %30 : i32 to index
      %32 = memref.load %arg1[%31] : memref<16xi32, #tpu.memory_space<smem>>
      %33 = arith.index_cast %32 : i32 to index
      %c0_12 = arith.constant 0 : index
      %c0_13 = arith.constant 0 : index
      %34 = vector.load %arg2[%33, %c0_12, %c0_13] : memref<32x1x128xf32, #tpu.memory_space<vmem>>, vector<1x1x128xf32>
      %35 = vector.shape_cast %34 : vector<1x1x128xf32> to vector<1x128xf32>
      %cst_14 = arith.constant 11.3137083 : f32
      %36 = vector.broadcast %cst_14 : f32 to vector<1x128xf32>
      %37 = arith.mulf %35, %36 : vector<1x128xf32>
      %38 = arith.index_cast %29 : i32 to index
      %c0_15 = arith.constant 0 : index
      %c0_16 = arith.constant 0 : index
      %39 = vector.load %arg3[%38, %c0_15, %c0_16] : memref<16x1x128xf32, #tpu.memory_space<vmem>>, vector<1x1x128xf32>
      %40 = vector.shape_cast %39 : vector<1x1x128xf32> to vector<1x128xf32>
      %41 = vector.shape_cast %37 : vector<1x128xf32> to vector<1x1x128xf32>
      tpu.vector_store %arg3[%38, %c0_15, %c0_16], %41 {strides = array<i32>} : memref<16x1x128xf32, #tpu.memory_space<vmem>>, vector<1x1x128xf32>,
      %c3_i32 = arith.constant 3 : i32
      %42 = arith.addi %2, %c3_i32 : i32
      %43 = arith.addi %0, %42 : i32
      %44 = arith.index_cast %43 : i32 to index
      %45 = memref.load %arg1[%44] : memref<16xi32, #tpu.memory_space<smem>>
      %46 = arith.index_cast %45 : i32 to index
      %c0_17 = arith.constant 0 : index
      %c0_18 = arith.constant 0 : index
      %47 = vector.load %arg2[%46, %c0_17, %c0_18] : memref<32x1x128xf32, #tpu.memory_space<vmem>>, vector<1x1x128xf32>
      %48 = vector.shape_cast %47 : vector<1x1x128xf32> to vector<1x128xf32>
      %cst_19 = arith.constant 11.3137083 : f32
      %49 = vector.broadcast %cst_19 : f32 to vector<1x128xf32>
      %50 = arith.mulf %48, %49 : vector<1x128xf32>
      %51 = arith.index_cast %42 : i32 to index
      %c0_20 = arith.constant 0 : index
      %c0_21 = arith.constant 0 : index
      %52 = vector.load %arg3[%51, %c0_20, %c0_21] : memref<16x1x128xf32, #tpu.memory_space<vmem>>, vector<1x1x128xf32>
      %53 = vector.shape_cast %52 : vector<1x1x128xf32> to vector<1x128xf32>
      %54 = vector.shape_cast %50 : vector<1x128xf32> to vector<1x1x128xf32>
      tpu.vector_store %arg3[%51, %c0_20, %c0_21], %54 {strides = array<i32>} : memref<16x1x128xf32, #tpu.memory_space<vmem>>, vector<1x1x128xf32>,
      %c4_i32 = arith.constant 4 : i32
      %55 = arith.addi %2, %c4_i32 : i32
      %56 = arith.addi %0, %55 : i32
      %57 = arith.index_cast %56 : i32 to index
      %58 = memref.load %arg1[%57] : memref<16xi32, #tpu.memory_space<smem>>
      %59 = arith.index_cast %58 : i32 to index
      %c0_22 = arith.constant 0 : index
      %c0_23 = arith.constant 0 : index
      %60 = vector.load %arg2[%59, %c0_22, %c0_23] : memref<32x1x128xf32, #tpu.memory_space<vmem>>, vector<1x1x128xf32>
      %61 = vector.shape_cast %60 : vector<1x1x128xf32> to vector<1x128xf32>
      %cst_24 = arith.constant 11.3137083 : f32
      %62 = vector.broadcast %cst_24 : f32 to vector<1x128xf32>
      %63 = arith.mulf %61, %62 : vector<1x128xf32>
      %64 = arith.index_cast %55 : i32 to index
      %c0_25 = arith.constant 0 : index
      %c0_26 = arith.constant 0 : index
      %65 = vector.load %arg3[%64, %c0_25, %c0_26] : memref<16x1x128xf32, #tpu.memory_space<vmem>>, vector<1x1x128xf32>
      %66 = vector.shape_cast %65 : vector<1x1x128xf32> to vector<1x128xf32>
      %67 = vector.shape_cast %63 : vector<1x128xf32> to vector<1x1x128xf32>
      tpu.vector_store %arg3[%64, %c0_25, %c0_26], %67 {strides = array<i32>} : memref<16x1x128xf32, #tpu.memory_space<vmem>>, vector<1x1x128xf32>,
      %c5_i32 = arith.constant 5 : i32
      %68 = arith.addi %2, %c5_i32 : i32
      %69 = arith.addi %0, %68 : i32
      %70 = arith.index_cast %69 : i32 to index
      %71 = memref.load %arg1[%70] : memref<16xi32, #tpu.memory_space<smem>>
      %72 = arith.index_cast %71 : i32 to index
      %c0_27 = arith.constant 0 : index
      %c0_28 = arith.constant 0 : index
      %73 = vector.load %arg2[%72, %c0_27, %c0_28] : memref<32x1x128xf32, #tpu.memory_space<vmem>>, vector<1x1x128xf32>
      %74 = vector.shape_cast %73 : vector<1x1x128xf32> to vector<1x128xf32>
      %cst_29 = arith.constant 11.3137083 : f32
      %75 = vector.broadcast %cst_29 : f32 to vector<1x128xf32>
      %76 = arith.mulf %74, %75 : vector<1x128xf32>
      %77 = arith.index_cast %68 : i32 to index
      %c0_30 = arith.constant 0 : index
      %c0_31 = arith.constant 0 : index
      %78 = vector.load %arg3[%77, %c0_30, %c0_31] : memref<16x1x128xf32, #tpu.memory_space<vmem>>, vector<1x1x128xf32>
      %79 = vector.shape_cast %78 : vector<1x1x128xf32> to vector<1x128xf32>
      %80 = vector.shape_cast %76 : vector<1x128xf32> to vector<1x1x128xf32>
      tpu.vector_store %arg3[%77, %c0_30, %c0_31], %80 {strides = array<i32>} : memref<16x1x128xf32, #tpu.memory_space<vmem>>, vector<1x1x128xf32>,
      %c6_i32 = arith.constant 6 : i32
      %81 = arith.addi %2, %c6_i32 : i32
      %82 = arith.addi %0, %81 : i32
      %83 = arith.index_cast %82 : i32 to index
      %84 = memref.load %arg1[%83] : memref<16xi32, #tpu.memory_space<smem>>
      %85 = arith.index_cast %84 : i32 to index
      %c0_32 = arith.constant 0 : index
      %c0_33 = arith.constant 0 : index
      %86 = vector.load %arg2[%85, %c0_32, %c0_33] : memref<32x1x128xf32, #tpu.memory_space<vmem>>, vector<1x1x128xf32>
      %87 = vector.shape_cast %86 : vector<1x1x128xf32> to vector<1x128xf32>
      %cst_34 = arith.constant 11.3137083 : f32
      %88 = vector.broadcast %cst_34 : f32 to vector<1x128xf32>
      %89 = arith.mulf %87, %88 : vector<1x128xf32>
      %90 = arith.index_cast %81 : i32 to index
      %c0_35 = arith.constant 0 : index
      %c0_36 = arith.constant 0 : index
      %91 = vector.load %arg3[%90, %c0_35, %c0_36] : memref<16x1x128xf32, #tpu.memory_space<vmem>>, vector<1x1x128xf32>
      %92 = vector.shape_cast %91 : vector<1x1x128xf32> to vector<1x128xf32>
      %93 = vector.shape_cast %89 : vector<1x128xf32> to vector<1x1x128xf32>
      tpu.vector_store %arg3[%90, %c0_35, %c0_36], %93 {strides = array<i32>} : memref<16x1x128xf32, #tpu.memory_space<vmem>>, vector<1x1x128xf32>,
      %c7_i32 = arith.constant 7 : i32
      %94 = arith.addi %2, %c7_i32 : i32
      %95 = arith.addi %0, %94 : i32
      %96 = arith.index_cast %95 : i32 to index
      %97 = memref.load %arg1[%96] : memref<16xi32, #tpu.memory_space<smem>>
      %98 = arith.index_cast %97 : i32 to index
      %c0_37 = arith.constant 0 : index
      %c0_38 = arith.constant 0 : index
      %99 = vector.load %arg2[%98, %c0_37, %c0_38] : memref<32x1x128xf32, #tpu.memory_space<vmem>>, vector<1x1x128xf32>
      %100 = vector.shape_cast %99 : vector<1x1x128xf32> to vector<1x128xf32>
      %cst_39 = arith.constant 11.3137083 : f32
      %101 = vector.broadcast %cst_39 : f32 to vector<1x128xf32>
      %102 = arith.mulf %100, %101 : vector<1x128xf32>
      %103 = arith.index_cast %94 : i32 to index
      %c0_40 = arith.constant 0 : index
      %c0_41 = arith.constant 0 : index
      %104 = vector.load %arg3[%103, %c0_40, %c0_41] : memref<16x1x128xf32, #tpu.memory_space<vmem>>, vector<1x1x128xf32>
      %105 = vector.shape_cast %104 : vector<1x1x128xf32> to vector<1x128xf32>
      %106 = vector.shape_cast %102 : vector<1x128xf32> to vector<1x1x128xf32>
      tpu.vector_store %arg3[%103, %c0_40, %c0_41], %106 {strides = array<i32>} : memref<16x1x128xf32, #tpu.memory_space<vmem>>, vector<1x1x128xf32>,
    }
    %c2_i32_0 = arith.constant 2 : i32
    return
  }
  func.func @transform_0(%arg0: i32, %arg1: memref<16xi32, #tpu.memory_space<smem>>) -> (i32, i32, i32) {
    %c0_i32 = arith.constant 0 : i32
    %c0_i32_0 = arith.constant 0 : i32
    %c0_i32_1 = arith.constant 0 : i32
    %c0_i32_2 = arith.constant 0 : i32
    return %c0_i32, %c0_i32_0, %c0_i32_1 : i32, i32, i32
  }
  func.func @transform_1(%arg0: i32, %arg1: memref<16xi32, #tpu.memory_space<smem>>) -> (i32, i32, i32) {
    %c0_i32 = arith.constant 0 : i32
    %c0_i32_0 = arith.constant 0 : i32
    %c0_i32_1 = arith.constant 0 : i32
    return %arg0, %c0_i32, %c0_i32_0 : i32, i32, i32
  }
}

</mosaic_0001>

<bundles_post_ra>
// kernel: tpu_custom_call.1
= control target key start
LH: loop header
LB: loop body
LE: loop exit
PB: predicated region body
PF: predicated region fallthrough
CT: control target
= control target key end

     0   :  { %s319_s0 = inlined_call_operand.hbm [shape: s32[16], index: 0, kind: input, shape index: {}]   ;;  %s320_s1 = inlined_call_operand.hbm [shape: f32[32,1,128], index: 1, kind: input, shape index: {}]   ;;  %s321_s2 = inlined_call_operand.hbm [shape: f32[16,1,128], index: 2, kind: output, shape index: {}]  }
   0x1   :  { %s180_s11 = scalar_lea.hbm %s319_s0, 16 }
   0x2   :  { %p181_p0 = scmp.ne.s32.totalorder %s319_s0, %s180_s11  ;;  %p184_p1 = scmp.lt.u32.totalorder %s180_s11, %s319_s0 }
   0x4   :  { %p186_p2 = pnand %p184_p1, %p181_p0 }
   0x6   :  { %189 = shalt.err (!%p186_p2)  }
   0x7   :  { %s248_s16 = smov [#allocation3]  }
   0x8   :  { %8 = dma.hbm_to_smem %s319_s0, 16, %s248_s16, [#allocation2] }
   0x9   :  { %238 = dma.done.wait [#allocation2], 16 }
   0xa   :  { %239 = vsyncadd [#allocation2], 4294967280 }
   0xb   :  { %10 = sfence }
   0xc   :  { %11 = vsyncpa [#allocation5], 0 }
   0xd   :  { %12 = vsyncpa [#allocation6], 0  ;;  %s249_s19 = smov [#allocation4]   ;;  %s190_s23 = scalar_lea.hbm %s320_s1, 512 }
   0xe   :  { %s18_s20 = sshll.u32 %s249_s19, 4  ;;  %p191_p3 = scmp.ne.s32.totalorder %s320_s1, %s190_s23  ;;  %s19_s20 = int_to_ptr.vmem [resolvable:$true] %s18_s20 }
   0xf   :  { %p194_p4 = scmp.lt.u32.totalorder %s190_s23, %s320_s1 }
  0x11   :  { %p196_p5 = pnand %p194_p4, %p191_p3 }
  0x13   :  { %199 = shalt.err (!%p196_p5)
}
  0x14   :  { %s200_s0 = scalar_lea.vmem %s19_s20, 512  ;;  %p205_p7 = scmp.lt.s32.totalorder %s19_s20, %s19_s20 }
  0x15   :  { %p201_p6 = scmp.ne.s32.totalorder %s19_s20, %s200_s0  ;;  %p206_p8 = scmp.lt.s32.totalorder %s200_s0, %s200_s0 }
  0x17   :  { %p207_p9 = por %p206_p8, %p205_p7 }
  0x19   :  { %p208_p10 = pnand %p207_p9, %p201_p6 }
  0x1b   :  { %211 = shalt.err (!%p208_p10)
}
  0x1c   :  { %s250_s28 = smov 16   ;;  %s251_s29 = smov 1  }
  0x1d   :  { %24 = dma.hbm_to_vmem [thread:$0]  %s320_s1, 512, %s19_s20, [#allocation5], %s250_s28, %s250_s28, %s251_s29  }
  0x1e   :  { %240 = dma.done.wait [#allocation5], 512  }
  0x1f   :  { %241 = vsyncadd [#allocation5], 4294966784  ;;  %s295_s4 = smov 0  }
  0x20 LB: > { %s152_s5 = sshll.u32 %s246_s4, 3  ;;  %s34_s4 = sadd.s32 1, %s246_s4   ;;  %s246_s4 = sphi %s295_s4, %s34_s4  }
  0x21   : > { %s37_s6 = sld [smem:[#allocation3 + %s152_s5]]  ;;  %s43_s7 = sadd.s32 1, %s152_s5 }
  0x22   : > { %s51_s8 = sadd.s32 2, %s152_s5  ;;  %s45_s9 = sld [smem:[#allocation3 + %s43_s7]] }
  0x23   : > { %s53_s10 = sld [smem:[#allocation3 + %s51_s8]]  ;;  %s59_s11 = sadd.s32 3, %s152_s5 }
  0x24   : > { %s67_s12 = sadd.s32 4, %s152_s5  ;;  %s61_s13 = sld [smem:[#allocation3 + %s59_s11]] }
  0x25   : > { %s69_s1 = sld [smem:[#allocation3 + %s67_s12]]  ;;  %s75_s14 = sadd.s32 5, %s152_s5 }
  0x26   : > { %s83_s15 = sadd.s32 6, %s152_s5  ;;  %s77_s16 = sld [smem:[#allocation3 + %s75_s14]] }
  0x27   : > { %s38_s17 = scalar_lea.vmem [#allocation4], %s37_s6  ;;  %s85_s18 = sld [smem:[#allocation3 + %s83_s15]] }
  0x28   : > { %v39_v0 = vld [vmem:[%s38_s17] sm:$0x1]  ;;  %s91_s19 = sadd.s32 7, %s152_s5  ;;  %s46_s20 = scalar_lea.vmem [#allocation4], %s45_s9 }
  0x29   : > { %v40_v1 = vmul.f32 11.313708, %v39_v0  ;;  %v47_v2 = vld [vmem:[%s46_s20] sm:$0x1]  ;;  %s54_s21 = scalar_lea.vmem [#allocation4], %s53_s10  ;;  %s93_s22 = sld [smem:[#allocation3 + %s91_s19]] }
  0x2a   : > { %v55_v3 = vld [vmem:[%s54_s21] sm:$0x1]  ;;  %s41_s23 = scalar_lea.vmem [#allocation7], %s152_s5  ;;  %v48_v4 = vmul.f32 11.313708, %v47_v2  ;;  %s62_s24 = scalar_lea.vmem [#allocation4], %s61_s13 }
  0x2b   : > { %42 = vst [vmem:[%s41_s23] sm:$0x1] %v40_v1  ;;  %v56_v5 = vmul.f32 11.313708, %v55_v3  ;;  %v63_v6 = vld [vmem:[%s62_s24] sm:$0x1]  ;;  %s70_s25 = scalar_lea.vmem [#allocation4], %s69_s1 }
  0x2c   : > { %v71_v7 = vld [vmem:[%s70_s25] sm:$0x1]  ;;  %154 = vst [vmem:[%s41_s23 + $0x1] sm:$0x1] %v48_v4  ;;  %v64_v8 = vmul.f32 11.313708, %v63_v6 }
  0x2d   : > { %156 = vst [vmem:[%s41_s23 + $0x2] sm:$0x1] %v56_v5  ;;  %v72_v9 = vmul.f32 11.313708, %v71_v7  ;;  %s78_s26 = scalar_lea.vmem [#allocation4], %s77_s16  ;;  %s86_s27 = scalar_lea.vmem [#allocation4], %s85_s18 }
  0x2e   : > { %v79_v10 = vld [vmem:[%s78_s26] sm:$0x1]  ;;  %158 = vst [vmem:[%s41_s23 + $0x3] sm:$0x1] %v64_v8  ;;  %p31_p11 = scmp.ge.s32.totalorder %s34_s4, 2  }
  0x2f   : > { %160 = vst [vmem:[%s41_s23 + $0x4] sm:$0x1] %v72_v9  ;;  %v80_v11 = vmul.f32 11.313708, %v79_v10  ;;  %v87_v12 = vld [vmem:[%s86_s27] sm:$0x1] }
  0x30   : > { %v88_v13 = vmul.f32 11.313708, %v87_v12  ;;  %s94_s0 = scalar_lea.vmem [#allocation4], %s93_s22  ;;  %33 = sbr.rel (!%p31_p11) target bundleno = 32 (0x20), region = 51 }
  0x31   : > { %162 = vst [vmem:[%s41_s23 + $0x5] sm:$0x1] %v80_v11  ;;  %v95_v14 = vld [vmem:[%s94_s0] sm:$0x1]  ;;  %s252_s30 = smov (%p31_p11), [#allocation7]  }
  0x32   : > { %164 = vst [vmem:[%s41_s23 + $0x6] sm:$0x1] %v88_v13  ;;  %v96_v15 = vmul.f32 11.313708, %v95_v14  ;;  %s104_s3 = sshll.u32 (%p31_p11), %s252_s30, 4  ;;  %s105_s3 = int_to_ptr.vmem [resolvable:$true] %s104_s3 }
  0x33   :  { %s212_s5 = scalar_lea.vmem (%p31_p11), %s105_s3, 256  ;;  %p217_p13 = scmp.lt.s32.totalorder (%p31_p11), %s105_s3, %s105_s3 }
  0x34   : > { %166 = vst [vmem:[%s41_s23 + $0x7] sm:$0x1] %v96_v15  ;;  %p213_p12 = scmp.ne.s32.totalorder (%p31_p11), %s105_s3, %s212_s5  ;;  %p218_p0 = scmp.lt.s32.totalorder (%p31_p11), %s212_s5, %s212_s5 }
  0x36   :  { %p219_p1 = por (%p31_p11), %p218_p0, %p217_p13 }
  0x38   :  { %p220_p2 = pnand %p219_p1, %p213_p12 }
  0x3a   :  { %223 = shalt.err (!%p220_p2)
}
  0x3b   :  { %s224_s8 = scalar_lea.hbm %s321_s2, 256 }
  0x3c   :  { %p225_p3 = scmp.ne.s32.totalorder %s321_s2, %s224_s8  ;;  %p228_p4 = scmp.lt.u32.totalorder %s224_s8, %s321_s2 }
  0x3e   :  { %p230_p5 = pnand %p228_p4, %p225_p3 }
  0x40   :  { %233 = shalt.err (!%p230_p5)
}
  0x41   :  { %110 = dma.vmem_to_hbm [thread:$0]  %s105_s3, 256, %s321_s2, [#allocation6], %s250_s28, %s250_s28, %s251_s29  }
  0x42   :  { %242 = dma.done.wait [#allocation6], 256  }
  0x43   :  { %243 = vsyncadd [#allocation6], 4294967040 }
  0x44   :  { %114 = vsyncpa [#allocation5], 1 }
  0x45   :  { %115 = vsyncpa [#allocation6], 1 }

</bundles_post_ra>
